<compile_context>
chip_gen: v5e
topology: v5e:2x2
jax: 0.10.0
libtpu: 0.0.40
codegen_flags: <defaults>
</compile_context>

<pallas_src>
import jax
import jax.numpy as jnp
import numpy as np
from jax.experimental import pallas as pl
from jax.experimental.pallas import tpu as pltpu


def _make_attention2_kernel(scale: float, heads: int, dim_head: int, inner_dim: int):
    def kernel(t1_ref, t2_ref, wq_ref, wkv_ref, wo_ref, bo_ref, o_ref):
        t1 = t1_ref[0]            # (n1, dim)  keys / values source
        t2 = t2_ref[0]            # (n2, dim)  queries source

        # Fused projections (Linear, no bias). Weights were pre-transposed to
        # (in, out) in the wrapper, so there is no in-kernel transpose.
        # Fold the attention scale into q here (applied once to (n2, inner)).
        q = jnp.dot(t2, wq_ref[...], preferred_element_type=jnp.float32) * scale  # (n2, inner)
        kv = jnp.dot(t1, wkv_ref[...], preferred_element_type=jnp.float32)        # (n1, 2*inner)
        k = kv[:, :inner_dim]                                                      # (n1, inner)
        v = kv[:, inner_dim:]                                                      # (n1, inner)

        # Per-head scaled-dot-product attention. `heads` is small and static,
        # so a short unrolled Python loop keeps everything as plain 2-D tiles.
        out_heads = []
        for h in range(heads):
            sl = slice(h * dim_head, (h + 1) * dim_head)
            qh = q[:, sl]                                    # (n2, dh)
            kh = k[:, sl]                                    # (n1, dh)
            vh = v[:, sl]                                    # (n1, dh)

            # q @ k^T via dot_general contracting last dims (no k transpose).
            dots = jax.lax.dot_general(
                qh, kh, (((1,), (1,)), ((), ())),
                preferred_element_type=jnp.float32)          # (n2, n1)

            m = jnp.max(dots, axis=-1, keepdims=True)
            p = jnp.exp(dots - m)
            l = jnp.sum(p, axis=-1, keepdims=True)           # (n2, 1)

            # EUP approximate reciprocal + one Newton-Raphson refinement step
            # (f32-accurate, stays off the VPU divide path, and normalizes the
            # (n2, dh) output instead of the (n2, n1) attention matrix).
            inv_l = pl.reciprocal(l, approx=True)
            inv_l = inv_l * (2.0 - l * inv_l)

            oh = jnp.dot(p, vh, preferred_element_type=jnp.float32) * inv_l  # (n2, dh)
            out_heads.append(oh)

        out = jnp.concatenate(out_heads, axis=-1)            # (n2, inner)

        # Single fused output projection + bias; one store per batch element.
        proj = jnp.dot(out, wo_ref[...], preferred_element_type=jnp.float32)  # (n2, dim)
        o_ref[0] = (proj + bo_ref[...]).astype(o_ref.dtype)

    return kernel


def attention2_pallas(t1, t2, wq, wk, wv, wo, bo, *, heads, dim_head, scale):
    """t1: (B, n1, dim) -> K,V source; t2: (B, n2, dim) -> Q source.
    wq/wk/wv: (inner_dim, dim) PyTorch Linear layout (out_features, in_features).
    wo: (dim, inner_dim), bo: (dim,).
    Returns (B, n2, dim) float32."""
    B, n1, dim = t1.shape
    _, n2, _ = t2.shape
    inner = heads * dim_head

    # One-time layout plumbing in the wrapper (zero in-kernel cost):
    #   PyTorch Linear stores W as (out_features, in_features); pre-transpose
    #   to (in, out) so the kernel computes x @ W with no .T, and fuse K/V.
    wq_t = jnp.transpose(wq)                                   # (dim, inner)
    wkv_t = jnp.transpose(jnp.concatenate([wk, wv], axis=0))   # (dim, 2*inner)
    wo_t = jnp.transpose(wo)                                   # (inner, dim)
    bo_2d = bo.reshape(1, dim)

    kernel = _make_attention2_kernel(scale, heads, dim_head, inner)

    return pl.pallas_call(
        kernel,
        out_shape=jax.ShapeDtypeStruct((B, n2, dim), jnp.float32),
        grid_spec=pltpu.PrefetchScalarGridSpec(
            num_scalar_prefetch=0,
            grid=(B,),
            in_specs=[
                pl.BlockSpec((1, n1, dim), lambda b: (b, 0, 0)),    # t1 (K/V source)
                pl.BlockSpec((1, n2, dim), lambda b: (b, 0, 0)),    # t2 (Q source)
                pl.BlockSpec((dim, inner), lambda b: (0, 0)),       # W_q^T        (DMAed once)
                pl.BlockSpec((dim, 2 * inner), lambda b: (0, 0)),   # [W_k;W_v]^T  (DMAed once)
                pl.BlockSpec((inner, dim), lambda b: (0, 0)),       # W_out^T      (DMAed once)
                pl.BlockSpec((1, dim), lambda b: (0, 0)),           # output-proj bias
            ],
            out_specs=pl.BlockSpec((1, n2, dim), lambda b: (b, 0, 0)),
        ),
        compiler_params=pltpu.CompilerParams(
            # batch is independent work -> shards across the 2 TCs on v7x.
            dimension_semantics=("parallel",)),
    )(t1, t2, wq_t, wkv_t, wo_t, bo_2d)


def attention2_reference(t1, t2, wq, wk, wv, wo, bo, *, heads, dim_head, scale):
    """Plain-JAX replica of the PyTorch forward (mask=None, dropout inactive)."""
    B, n1, dim = t1.shape
    _, n2, _ = t2.shape
    H, dh = heads, dim_head
    q = t2 @ wq.T
    k = t1 @ wk.T
    v = t1 @ wv.T

    def split(x, n):
        return x.reshape(B, n, H, dh).transpose(0, 2, 1, 3)

    q, k, v = split(q, n2), split(k, n1), split(v, n1)
    dots = jnp.einsum('bhid,bhjd->bhij', q, k) * scale
    attn = jax.nn.softmax(dots, axis=-1)
    out = jnp.einsum('bhij,bhjd->bhid', attn, v)
    out = out.transpose(0, 2, 1, 3).reshape(B, n2, H * dh)
    return out @ wo.T + bo


if __name__ == "__main__":
    # Small shapes consistent with the module.
    B = 2
    N1 = 8          # t1 sequence length (keys/values)
    N2 = 8          # t2 sequence length (queries)
    DIM = 32
    HEADS = 4
    DIM_HEAD = 16
    INNER = HEADS * DIM_HEAD
    SCALE = DIM ** (-0.5)   # module scales by dim**-0.5, not dim_head**-0.5

    key = jax.random.PRNGKey(0)
    k1, k2, k3, k4, k5, k6, k7 = jax.random.split(key, 7)

    t1 = jax.random.normal(k1, (B, N1, DIM), dtype=jnp.float32)
    t2 = jax.random.normal(k2, (B, N2, DIM), dtype=jnp.float32)

    # Deterministic "Linear" parameters (PyTorch layout: (out_features, in_features)).
    wq = jax.random.normal(k3, (INNER, DIM), dtype=jnp.float32) * 0.05
    wk = jax.random.normal(k4, (INNER, DIM), dtype=jnp.float32) * 0.05
    wv = jax.random.normal(k5, (INNER, DIM), dtype=jnp.float32) * 0.05
    wo = jax.random.normal(k6, (DIM, INNER), dtype=jnp.float32) * 0.05
    bo = jax.random.normal(k7, (DIM,), dtype=jnp.float32) * 0.05

    out = attention2_pallas(t1, t2, wq, wk, wv, wo, bo,
                            heads=HEADS, dim_head=DIM_HEAD, scale=SCALE)
    out = jax.block_until_ready(out)

    ref = attention2_reference(t1, t2, wq, wk, wv, wo, bo,
                               heads=HEADS, dim_head=DIM_HEAD, scale=SCALE)
    np.testing.assert_allclose(np.asarray(out), np.asarray(ref), rtol=2e-4, atol=2e-4)

    print("KERNEL_OK")
</pallas_src>

<mosaic_0001>
module attributes {stable_mosaic.version = 11 : i64} {
  func.func @kernel(%arg0: i32, %arg1: memref<1x8x32xf32, #tpu.memory_space<vmem>>, %arg2: memref<1x8x32xf32, #tpu.memory_space<vmem>>, %arg3: memref<32x64xf32, #tpu.memory_space<vmem>>, %arg4: memref<32x128xf32, #tpu.memory_space<vmem>>, %arg5: memref<64x32xf32, #tpu.memory_space<vmem>>, %arg6: memref<1x32xf32, #tpu.memory_space<vmem>>, %arg7: memref<1x8x32xf32, #tpu.memory_space<vmem>>) attributes {dimension_semantics = [#tpu.dimension_semantics<parallel>], iteration_bounds = array<i64: 2>, scalar_prefetch = 0 : i64, scratch_operands = 0 : i64, tpu.core_type = #tpu.core_type<tc>, window_params = [{transform_indices = @transform_0, window_bounds = array<i64: 1, 8, 32>}, {transform_indices = @transform_1, window_bounds = array<i64: 1, 8, 32>}, {pipeline_mode = #tpu.pipeline_mode<synchronous>, transform_indices = @transform_2, window_bounds = array<i64: 32, 64>}, {pipeline_mode = #tpu.pipeline_mode<synchronous>, transform_indices = @transform_3, window_bounds = array<i64: 32, 128>}, {pipeline_mode = #tpu.pipeline_mode<synchronous>, transform_indices = @transform_4, window_bounds = array<i64: 64, 32>}, {pipeline_mode = #tpu.pipeline_mode<synchronous>, transform_indices = @transform_5, window_bounds = array<i64: 1, 32>}, {transform_indices = @transform_6, window_bounds = array<i64: 1, 8, 32>}]} {
    %c0 = arith.constant 0 : index
    %c0_0 = arith.constant 0 : index
    %c0_1 = arith.constant 0 : index
    %0 = vector.load %arg1[%c0, %c0_0, %c0_1] : memref<1x8x32xf32, #tpu.memory_space<vmem>>, vector<1x8x32xf32>
    %1 = vector.shape_cast %0 : vector<1x8x32xf32> to vector<8x32xf32>
    %c0_2 = arith.constant 0 : index
    %c0_3 = arith.constant 0 : index
    %c0_4 = arith.constant 0 : index
    %2 = vector.load %arg2[%c0_2, %c0_3, %c0_4] : memref<1x8x32xf32, #tpu.memory_space<vmem>>, vector<1x8x32xf32>
    %3 = vector.shape_cast %2 : vector<1x8x32xf32> to vector<8x32xf32>
    %c0_5 = arith.constant 0 : index
    %c0_6 = arith.constant 0 : index
    %4 = vector.load %arg3[%c0_5, %c0_6] : memref<32x64xf32, #tpu.memory_space<vmem>>, vector<32x64xf32>
    %cst = arith.constant dense<0.000000e+00> : vector<8x64xf32>
    %5 = tpu.matmul %3, %4, %cst {dimension_numbers = #tpu.dot_dimension_numbers<[1], [0], [0], [1], [0, 0, 1, 1], [], []>} : vector<8x32xf32>, vector<32x64xf32>, vector<8x64xf32> -> vector<8x64xf32>
    %cst_7 = arith.constant 0.176776692 : f32
    %6 = vector.broadcast %cst_7 : f32 to vector<8x64xf32>
    %7 = arith.mulf %5, %6 : vector<8x64xf32>
    %c0_8 = arith.constant 0 : index
    %c0_9 = arith.constant 0 : index
    %8 = vector.load %arg4[%c0_8, %c0_9] : memref<32x128xf32, #tpu.memory_space<vmem>>, vector<32x128xf32>
    %cst_10 = arith.constant dense<0.000000e+00> : vector<8x128xf32>
    %9 = tpu.matmul %1, %8, %cst_10 {dimension_numbers = #tpu.dot_dimension_numbers<[1], [0], [0], [1], [0, 0, 1, 1], [], []>} : vector<8x32xf32>, vector<32x128xf32>, vector<8x128xf32> -> vector<8x128xf32>
    %10 = vector.extract_strided_slice %9 {offsets = [0, 0], sizes = [8, 64], strides = [1, 1]} : vector<8x128xf32> to vector<8x64xf32>
    %11 = vector.extract_strided_slice %9 {offsets = [0, 64], sizes = [8, 64], strides = [1, 1]} : vector<8x128xf32> to vector<8x64xf32>
    %12 = vector.extract_strided_slice %7 {offsets = [0, 0], sizes = [8, 16], strides = [1, 1]} : vector<8x64xf32> to vector<8x16xf32>
    %13 = vector.extract_strided_slice %10 {offsets = [0, 0], sizes = [8, 16], strides = [1, 1]} : vector<8x64xf32> to vector<8x16xf32>
    %14 = vector.extract_strided_slice %11 {offsets = [0, 0], sizes = [8, 16], strides = [1, 1]} : vector<8x64xf32> to vector<8x16xf32>
    %cst_11 = arith.constant dense<0.000000e+00> : vector<8x8xf32>
    %15 = tpu.matmul %12, %13, %cst_11 {dimension_numbers = #tpu.dot_dimension_numbers<[1], [1], [0], [0], [0, 0, 1, 0], [], []>} : vector<8x16xf32>, vector<8x16xf32>, vector<8x8xf32> -> vector<8x8xf32>
    %cst_12 = arith.constant dense<0xFF800000> : vector<8xf32>
    %16 = vector.multi_reduction <maximumf>, %15, %cst_12 [1] : vector<8x8xf32> to vector<8xf32>
    %17 = vector.shape_cast %16 : vector<8xf32> to vector<8x1xf32>
    %18 = vector.broadcast %17 : vector<8x1xf32> to vector<8x8xf32>
    %19 = arith.subf %15, %18 : vector<8x8xf32>
    %20 = math.exp %19 : vector<8x8xf32>
    %cst_13 = arith.constant dense<0.000000e+00> : vector<8xf32>
    %21 = vector.multi_reduction <add>, %20, %cst_13 [1] : vector<8x8xf32> to vector<8xf32>
    %22 = vector.shape_cast %21 : vector<8xf32> to vector<8x1xf32>
    %23 = tpu.reciprocal %22 {approx = true} : vector<8x1xf32> -> vector<8x1xf32>
    %24 = arith.mulf %22, %23 : vector<8x1xf32>
    %cst_14 = arith.constant 2.000000e+00 : f32
    %25 = vector.broadcast %cst_14 : f32 to vector<8x1xf32>
    %26 = arith.subf %25, %24 : vector<8x1xf32>
    %27 = arith.mulf %23, %26 : vector<8x1xf32>
    %cst_15 = arith.constant dense<0.000000e+00> : vector<8x16xf32>
    %28 = tpu.matmul %20, %14, %cst_15 {dimension_numbers = #tpu.dot_dimension_numbers<[1], [0], [0], [1], [0, 0, 1, 1], [], []>} : vector<8x8xf32>, vector<8x16xf32>, vector<8x16xf32> -> vector<8x16xf32>
    %29 = vector.broadcast %27 : vector<8x1xf32> to vector<8x16xf32>
    %30 = arith.mulf %28, %29 : vector<8x16xf32>
    %31 = vector.extract_strided_slice %7 {offsets = [0, 16], sizes = [8, 16], strides = [1, 1]} : vector<8x64xf32> to vector<8x16xf32>
    %32 = vector.extract_strided_slice %10 {offsets = [0, 16], sizes = [8, 16], strides = [1, 1]} : vector<8x64xf32> to vector<8x16xf32>
    %33 = vector.extract_strided_slice %11 {offsets = [0, 16], sizes = [8, 16], strides = [1, 1]} : vector<8x64xf32> to vector<8x16xf32>
    %cst_16 = arith.constant dense<0.000000e+00> : vector<8x8xf32>
    %34 = tpu.matmul %31, %32, %cst_16 {dimension_numbers = #tpu.dot_dimension_numbers<[1], [1], [0], [0], [0, 0, 1, 0], [], []>} : vector<8x16xf32>, vector<8x16xf32>, vector<8x8xf32> -> vector<8x8xf32>
    %cst_17 = arith.constant dense<0xFF800000> : vector<8xf32>
    %35 = vector.multi_reduction <maximumf>, %34, %cst_17 [1] : vector<8x8xf32> to vector<8xf32>
    %36 = vector.shape_cast %35 : vector<8xf32> to vector<8x1xf32>
    %37 = vector.broadcast %36 : vector<8x1xf32> to vector<8x8xf32>
    %38 = arith.subf %34, %37 : vector<8x8xf32>
    %39 = math.exp %38 : vector<8x8xf32>
    %cst_18 = arith.constant dense<0.000000e+00> : vector<8xf32>
    %40 = vector.multi_reduction <add>, %39, %cst_18 [1] : vector<8x8xf32> to vector<8xf32>
    %41 = vector.shape_cast %40 : vector<8xf32> to vector<8x1xf32>
    %42 = tpu.reciprocal %41 {approx = true} : vector<8x1xf32> -> vector<8x1xf32>
    %43 = arith.mulf %41, %42 : vector<8x1xf32>
    %cst_19 = arith.constant 2.000000e+00 : f32
    %44 = vector.broadcast %cst_19 : f32 to vector<8x1xf32>
    %45 = arith.subf %44, %43 : vector<8x1xf32>
    %46 = arith.mulf %42, %45 : vector<8x1xf32>
    %cst_20 = arith.constant dense<0.000000e+00> : vector<8x16xf32>
    %47 = tpu.matmul %39, %33, %cst_20 {dimension_numbers = #tpu.dot_dimension_numbers<[1], [0], [0], [1], [0, 0, 1, 1], [], []>} : vector<8x8xf32>, vector<8x16xf32>, vector<8x16xf32> -> vector<8x16xf32>
    %48 = vector.broadcast %46 : vector<8x1xf32> to vector<8x16xf32>
    %49 = arith.mulf %47, %48 : vector<8x16xf32>
    %50 = vector.extract_strided_slice %7 {offsets = [0, 32], sizes = [8, 16], strides = [1, 1]} : vector<8x64xf32> to vector<8x16xf32>
    %51 = vector.extract_strided_slice %10 {offsets = [0, 32], sizes = [8, 16], strides = [1, 1]} : vector<8x64xf32> to vector<8x16xf32>
    %52 = vector.extract_strided_slice %11 {offsets = [0, 32], sizes = [8, 16], strides = [1, 1]} : vector<8x64xf32> to vector<8x16xf32>
    %cst_21 = arith.constant dense<0.000000e+00> : vector<8x8xf32>
    %53 = tpu.matmul %50, %51, %cst_21 {dimension_numbers = #tpu.dot_dimension_numbers<[1], [1], [0], [0], [0, 0, 1, 0], [], []>} : vector<8x16xf32>, vector<8x16xf32>, vector<8x8xf32> -> vector<8x8xf32>
    %cst_22 = arith.constant dense<0xFF800000> : vector<8xf32>
    %54 = vector.multi_reduction <maximumf>, %53, %cst_22 [1] : vector<8x8xf32> to vector<8xf32>
    %55 = vector.shape_cast %54 : vector<8xf32> to vector<8x1xf32>
    %56 = vector.broadcast %55 : vector<8x1xf32> to vector<8x8xf32>
    %57 = arith.subf %53, %56 : vector<8x8xf32>
    %58 = math.exp %57 : vector<8x8xf32>
    %cst_23 = arith.constant dense<0.000000e+00> : vector<8xf32>
    %59 = vector.multi_reduction <add>, %58, %cst_23 [1] : vector<8x8xf32> to vector<8xf32>
    %60 = vector.shape_cast %59 : vector<8xf32> to vector<8x1xf32>
    %61 = tpu.reciprocal %60 {approx = true} : vector<8x1xf32> -> vector<8x1xf32>
    %62 = arith.mulf %60, %61 : vector<8x1xf32>
    %cst_24 = arith.constant 2.000000e+00 : f32
    %63 = vector.broadcast %cst_24 : f32 to vector<8x1xf32>
    %64 = arith.subf %63, %62 : vector<8x1xf32>
    %65 = arith.mulf %61, %64 : vector<8x1xf32>
    %cst_25 = arith.constant dense<0.000000e+00> : vector<8x16xf32>
    %66 = tpu.matmul %58, %52, %cst_25 {dimension_numbers = #tpu.dot_dimension_numbers<[1], [0], [0], [1], [0, 0, 1, 1], [], []>} : vector<8x8xf32>, vector<8x16xf32>, vector<8x16xf32> -> vector<8x16xf32>
    %67 = vector.broadcast %65 : vector<8x1xf32> to vector<8x16xf32>
    %68 = arith.mulf %66, %67 : vector<8x16xf32>
    %69 = vector.extract_strided_slice %7 {offsets = [0, 48], sizes = [8, 16], strides = [1, 1]} : vector<8x64xf32> to vector<8x16xf32>
    %70 = vector.extract_strided_slice %10 {offsets = [0, 48], sizes = [8, 16], strides = [1, 1]} : vector<8x64xf32> to vector<8x16xf32>
    %71 = vector.extract_strided_slice %11 {offsets = [0, 48], sizes = [8, 16], strides = [1, 1]} : vector<8x64xf32> to vector<8x16xf32>
    %cst_26 = arith.constant dense<0.000000e+00> : vector<8x8xf32>
    %72 = tpu.matmul %69, %70, %cst_26 {dimension_numbers = #tpu.dot_dimension_numbers<[1], [1], [0], [0], [0, 0, 1, 0], [], []>} : vector<8x16xf32>, vector<8x16xf32>, vector<8x8xf32> -> vector<8x8xf32>
    %cst_27 = arith.constant dense<0xFF800000> : vector<8xf32>
    %73 = vector.multi_reduction <maximumf>, %72, %cst_27 [1] : vector<8x8xf32> to vector<8xf32>
    %74 = vector.shape_cast %73 : vector<8xf32> to vector<8x1xf32>
    %75 = vector.broadcast %74 : vector<8x1xf32> to vector<8x8xf32>
    %76 = arith.subf %72, %75 : vector<8x8xf32>
    %77 = math.exp %76 : vector<8x8xf32>
    %cst_28 = arith.constant dense<0.000000e+00> : vector<8xf32>
    %78 = vector.multi_reduction <add>, %77, %cst_28 [1] : vector<8x8xf32> to vector<8xf32>
    %79 = vector.shape_cast %78 : vector<8xf32> to vector<8x1xf32>
    %80 = tpu.reciprocal %79 {approx = true} : vector<8x1xf32> -> vector<8x1xf32>
    %81 = arith.mulf %79, %80 : vector<8x1xf32>
    %cst_29 = arith.constant 2.000000e+00 : f32
    %82 = vector.broadcast %cst_29 : f32 to vector<8x1xf32>
    %83 = arith.subf %82, %81 : vector<8x1xf32>
    %84 = arith.mulf %80, %83 : vector<8x1xf32>
    %cst_30 = arith.constant dense<0.000000e+00> : vector<8x16xf32>
    %85 = tpu.matmul %77, %71, %cst_30 {dimension_numbers = #tpu.dot_dimension_numbers<[1], [0], [0], [1], [0, 0, 1, 1], [], []>} : vector<8x8xf32>, vector<8x16xf32>, vector<8x16xf32> -> vector<8x16xf32>
    %86 = vector.broadcast %84 : vector<8x1xf32> to vector<8x16xf32>
    %87 = arith.mulf %85, %86 : vector<8x16xf32>
    %88 = tpu.concatenate %30, %49, %68, %87 in 1 : vector<8x16xf32>, vector<8x16xf32>, vector<8x16xf32>, vector<8x16xf32> -> vector<8x64xf32>
    %c0_31 = arith.constant 0 : index
    %c0_32 = arith.constant 0 : index
    %89 = vector.load %arg5[%c0_31, %c0_32] : memref<64x32xf32, #tpu.memory_space<vmem>>, vector<64x32xf32>
    %cst_33 = arith.constant dense<0.000000e+00> : vector<8x32xf32>
    %90 = tpu.matmul %88, %89, %cst_33 {dimension_numbers = #tpu.dot_dimension_numbers<[1], [0], [0], [1], [0, 0, 1, 1], [], []>} : vector<8x64xf32>, vector<64x32xf32>, vector<8x32xf32> -> vector<8x32xf32>
    %c0_34 = arith.constant 0 : index
    %c0_35 = arith.constant 0 : index
    %91 = vector.load %arg6[%c0_34, %c0_35] : memref<1x32xf32, #tpu.memory_space<vmem>>, vector<1x32xf32>
    %92 = vector.broadcast %91 : vector<1x32xf32> to vector<8x32xf32>
    %93 = arith.addf %90, %92 : vector<8x32xf32>
    %c0_36 = arith.constant 0 : index
    %c0_37 = arith.constant 0 : index
    %c0_38 = arith.constant 0 : index
    %94 = vector.load %arg7[%c0_36, %c0_37, %c0_38] : memref<1x8x32xf32, #tpu.memory_space<vmem>>, vector<1x8x32xf32>
    %95 = vector.shape_cast %94 : vector<1x8x32xf32> to vector<8x32xf32>
    %96 = vector.shape_cast %93 : vector<8x32xf32> to vector<1x8x32xf32>
    tpu.vector_store %arg7[%c0_36, %c0_37, %c0_38], %96 {strides = array<i32>} : memref<1x8x32xf32, #tpu.memory_space<vmem>>, vector<1x8x32xf32>,
    return
  }
  func.func @transform_0(%arg0: i32) -> (i32, i32, i32) {
    %c0_i32 = arith.constant 0 : i32
    %c0_i32_0 = arith.constant 0 : i32
    %c0_i32_1 = arith.constant 0 : i32
    return %arg0, %c0_i32, %c0_i32_0 : i32, i32, i32
  }
  func.func @transform_1(%arg0: i32) -> (i32, i32, i32) {
    %c0_i32 = arith.constant 0 : i32
    %c0_i32_0 = arith.constant 0 : i32
    %c0_i32_1 = arith.constant 0 : i32
    return %arg0, %c0_i32, %c0_i32_0 : i32, i32, i32
  }
  func.func @transform_2(%arg0: i32) -> (i32, i32) {
    %c0_i32 = arith.constant 0 : i32
    %c0_i32_0 = arith.constant 0 : i32
    %c0_i32_1 = arith.constant 0 : i32
    return %c0_i32, %c0_i32_0 : i32, i32
  }
  func.func @transform_3(%arg0: i32) -> (i32, i32) {
    %c0_i32 = arith.constant 0 : i32
    %c0_i32_0 = arith.constant 0 : i32
    %c0_i32_1 = arith.constant 0 : i32
    return %c0_i32, %c0_i32_0 : i32, i32
  }
  func.func @transform_4(%arg0: i32) -> (i32, i32) {
    %c0_i32 = arith.constant 0 : i32
    %c0_i32_0 = arith.constant 0 : i32
    %c0_i32_1 = arith.constant 0 : i32
    return %c0_i32, %c0_i32_0 : i32, i32
  }
  func.func @transform_5(%arg0: i32) -> (i32, i32) {
    %c0_i32 = arith.constant 0 : i32
    %c0_i32_0 = arith.constant 0 : i32
    %c0_i32_1 = arith.constant 0 : i32
    return %c0_i32, %c0_i32_0 : i32, i32
  }
  func.func @transform_6(%arg0: i32) -> (i32, i32, i32) {
    %c0_i32 = arith.constant 0 : i32
    %c0_i32_0 = arith.constant 0 : i32
    %c0_i32_1 = arith.constant 0 : i32
    return %arg0, %c0_i32, %c0_i32_0 : i32, i32, i32
  }
}

</mosaic_0001>

<bundles_post_ra>
// kernel: tpu_custom_call.1
= control target key start
LH: loop header
LB: loop body
LE: loop exit
PB: predicated region body
PF: predicated region fallthrough
CT: control target
= control target key end

     0   :  { %11 = vsyncpa [#allocation3], 0  ;;  %s1102_s0 = inlined_call_operand.vmem [shape: f32[2,8,32], index: 0, kind: input, shape index: {}]   ;;  %s1103_s1 = inlined_call_operand.vmem [shape: f32[2,8,32], index: 1, kind: input, shape index: {}]   ;;  %s1104_s2 = inlined_call_operand.vmem [shape: f32[32,64], index: 2, kind: input, shape index: {}]   ;;  %s1105_s3 = inlined_call_operand.vmem [shape: f32[32,128], index: 3, kind: input, shape index: {}]   ;;  %s1106_s4 = inlined_call_operand.vmem [shape: f32[64,32], index: 4, kind: input, shape index: {}]   ;;  %s1107_s5 = inlined_call_operand.vmem [shape: f32[1,32], index: 5, kind: input, shape index: {}]   ;;  %s1108_s6 = inlined_call_operand.hbm [shape: f32[2,8,32], index: 6, kind: output, shape index: {}]  }
   0x1   :  { %13 = vsyncpa [#allocation3 + $0x1], 0  ;;  %s929_s21 = smov 0   ;;  %s931_s22 = smov 0  }
   0x2   :  { %s933_s23 = smov 0   ;;  %s935_s24 = smov 0  }
   0x3 LB: > { %s950_s25 = sadd.s32 4294967295, %s885_s24   ;;  %s734_s26 = sadd.s32 4294967294, %s885_s24   ;;  %s885_s24 = sphi %s935_s24, %s1114_s24   ;;  %s881_s23 = sphi %s933_s23, %s1113_s23   ;;  %s877_s22 = sphi %s931_s22, %s1112_s22   ;;  %s873_s21 = sphi %s929_s21, %s1111_s21  }
   0x4   : > { %s954_s27 = sadd.s32 1, %s885_s24   ;;  %s162_s28 = sadd.s32 1, %s881_s23 }
   0x5   : > { %s159_s29 = ssub.s32 %s885_s24, %s954_s27  ;;  %p172_p0 = scmp.ne.s32.totalorder %s881_s23, %s877_s22 }
   0x6   : > { %p160_p1 = scmp.eq.s32.totalorder %s159_s29, 0  ;;  %p173_p2 = scmp.eq.s32.totalorder %s950_s25, 1 }
   0x7   : > { %p178_p3 = scmp.ne.s32.totalorder %s877_s22, %s873_s21  ;;  %p179_p4 = scmp.eq.s32.totalorder %s734_s26, 1 }
   0x8   : > { %s965_s30 = scalar_select %p160_p1, %s881_s23, %s162_s28  }
   0x9   : > { %p967_p5 = por %p173_p2, %p172_p0  ;;  %p971_p6 = por %p179_p4, %p178_p3 }
   0xa   : > { %p737_p7 = scmp.ge.s32.totalorder %s885_s24, 1  ;;  %p223_p8 = scmp.lt.s32.totalorder %s885_s24, 3 }
   0xc   : > { %p224_p9 = pnand %p737_p7, %p223_p8 }
   0xd   : > { %p256_p10 = scmp.lt.s32.totalorder (!%p224_p9), %s950_s25, 1  ;;  %s887_s19 = smov (!%p224_p9), 80  }
   0xe   : > { %227 = sbr.rel (%p224_p9) target bundleno = 1107 (0x453), region = 44  ;;  %s888_s20 = smov (!%p224_p9), 112  }
   0xf   : > { %s891_s28 = smov (!%p224_p9), 48   ;;  %s892_s29 = smov (!%p224_p9), 32  }
  0x10   : > { %s893_s9 = smov (!%p224_p9), 16   ;;  %s253_s11 = sand.u32 (!%p224_p9), 1, %s877_s22  }
  0x11   : > { %s738_s12 = sshll.u32 (!%p224_p9), %s253_s11, 3  ;;  %s757_s13 = sshll.u32 (!%p224_p9), %s950_s25, 3 }
  0x12   : > { %s658_s16 = scalar_lea.hbm (!%p224_p9), %s1108_s6, %s757_s13 }
  0x13   : > { %v269_v0 = vld [vmem:[%s1104_s2 + $0x18] sm:$0xff]  ;;  %v268_v1 = vld [vmem:[%s1104_s2 + $0x10] sm:$0xff]  ;;  %v267_v2 = vld [vmem:[%s1104_s2 + $0x8] sm:$0xff]  ;;  %s257_s15 = scalar_select %p256_p10, %s950_s25, 1  ;;  %vm270_vm0 = vcmask 261120   ;;  %vm322_vm1 = vcmask 130048  }
  0x14   : > { %286 = vmatpush.msra.mxu1 %v269_v0  ;;  %v266_v3 = vld [vmem:[%s1104_s2] sm:$0xff]  ;;  %v298_v5 = vld [vmem:[%s1105_s3 + $0x18] sm:$0xff]  ;;  %v297_v6 = vld [vmem:[%s1105_s3 + $0x10] sm:$0xff]  ;;  %vm349_vm2 = vcmask 64512   ;;  %vm608_vm3 = vcmask 392192   ;;  %vm622_vm4 = vcmask 523264  }
  0x15   : > { %s739_s18 = sshll.u32 %s257_s15, 3  ;;  %v296_v7 = vld [vmem:[%s1105_s3 + $0x8] sm:$0xff]  ;;  %v295_v8 = vld [vmem:[%s1105_s3] sm:$0xff] }
  0x16   : > { %287 = vmatpush.msra.mxu1 %v268_v1  ;;  %s263_s26 = scalar_lea.vmem %s1103_s1, %s739_s18  ;;  %s259_s15 = scalar_lea.vmem %s1102_s0, %s739_s18 }
  0x17   : > { %v265_v4 = vld [vmem:[%s263_s26] sm:$0xff]  ;;  %s889_s18 = smov 96   ;;  %s890_s26 = smov 64  }
  0x18   : > { %288 = vmatpush.msra.mxu1 %v267_v2  ;;  %v264_v9 = vld [vmem:[%s259_s15] sm:$0xff] }
  0x1a   : > { %289 = vmatpush.msra.mxu1 %v266_v3 }
  0x1b   : > { %741 = vmatmul.msk.f32.vlgmr.msra.gmra.mxu1 %vm270_vm0, %v265_v4 }
  0x1c   : > { %314 = vmatpush.msrb.mxu1 %v298_v5 }
  0x1e   : > { %315 = vmatpush.msrb.mxu1 %v297_v6 }
  0x20   : > { %316 = vmatpush.msrb.mxu1 %v296_v7 }
  0x22   : > { %317 = vmatpush.msrb.mxu1 %v295_v8 }
  0x23   : > { %742 = vmatmul.msk.f32.vlgmr.msrb.gmra.mxu1 %vm270_vm0, %v264_v9  ;;  %v617_v9 = vld [vmem:[%s1106_s4 + $0x38] sm:$0xff] }
  0x98   : > { %v291_v10 = vpop.f32.mrf.mxu1 }
  0x99   : > { %v294_v12 = vmul.f32 0.17677669, %v291_v10  ;;  %v616_v10 = vld [vmem:[%s1106_s4 + $0x30] sm:$0xff] }
  0xa0   : > { %v319_v11 = vpop.f32.mrf.mxu1 }
  0xa1   : > { %528 = vrot.lane.b32.xlu2 %v319_v11, %s887_s19  ;;  %392 = vrot.lane.b32.xlu1 %v319_v11, %s888_s20 }
  0xa2   : > { %743 = vmatpush.xpose.msk.msra.mxu2 %vm322_vm1, %v319_v11 }
  0xa5   : > { %744 = vmatmul.msk.f32.vlgmr.msra.gmra.mxu2 %vm322_vm1, %v294_v12 }
  0xa9   : > { %526 = vrot.lane.b32.xlu2 %v294_v12, %s887_s19  ;;  %390 = vrot.lane.b32.xlu1 %v294_v12, %s888_s20  ;;  %s255_s20 = scalar_lea.vmem [#allocation2], %s738_s12  ;;  %s843_s12 = scalar_lea.hbm %s1108_s6, 16 }
  0xb1   : > { %458 = vrot.lane.b32.xlu2 %v294_v12, %s889_s18  ;;  %460 = vrot.lane.b32.xlu1 %v319_v11, %s889_s18  ;;  %v614_v12 = vld [vmem:[%s1106_s4 + $0x20] sm:$0xff]  ;;  %s660_s18 = sshll.u32 %s255_s20, 4  ;;  %s661_s18 = int_to_ptr.vmem [resolvable:$true] %s660_s18 }
  0xfb   : > { %v529_v13 = vpop.permute.xlu2 %528 }
 0x103   : > { %v527_v16 = vpop.permute.xlu2 %526 }
 0x10b   : > { %v459_v18 = vpop.permute.xlu2 %458 }
 0x113   : > { %v393_v14 = vpop.permute.xlu1 %392 }
 0x11b   : > { %v391_v15 = vpop.permute.xlu1 %390 }
 0x123   : > { %v461_v17 = vpop.permute.xlu1 %460 }
 0x124   : > { %749 = vmatpush.xpose.msk.msra.mxu0 %vm322_vm1, %v461_v17 }
 0x127   : > { %750 = vmatmul.msk.f32.vlgmr.msra.gmra.mxu0 %vm322_vm1, %v459_v18 }
 0x128   : > { %v346_v19 = vpop.f32.mrf.mxu2  ;;  %634 = vmatpush.msrb.mxu0 %v617_v9 }
 0x129   : > { %v350_v20 = vsel %vm349_vm2, %v346_v19, -inf }
 0x12a   : > { %351 = vmax.xlane.f32.xlu0 %v350_v20  ;;  %635 = vmatpush.msrb.mxu0 %v616_v10 }
 0x13e   : > { %363 = vrot.lane.b32.xlu0 %v319_v11, %s890_s26  ;;  %s662_s26 = sshll.u32 %s658_s16, 4  ;;  %s663_s26 = int_to_ptr.hbm [resolvable:$true] %s662_s26 }
 0x13f   : > { %s837_s25 = sshra.s32 %s663_s26, 4  ;;  %s838_s25 = int_to_ptr.hbm [resolvable:$true] %s837_s25 }
 0x140   : > { %p844_p0 = scmp.lt.s32.totalorder %s838_s25, %s1108_s6 }
 0x146   : > { %431 = vrot.lane.b32.xlu0 %v319_v11, %s891_s28 }
 0x19d   : > { %v352_v21 = vpop.xlane.xlu0 %351 }
 0x19e   : > { %v353_v22 = vsub.f32 %v346_v19, %v352_v21 }
 0x1a0   : > { %v354_v25 = vmul.f32 1.442695, %v353_v22 }
 0x1a2   : > { %807 = vpow2.f32 %v354_v25 }
 0x1a4   : > { %v483_v23 = vpop.f32.mrf.mxu0 }
 0x1a5   : > { %v486_v24 = vsel %vm349_vm2, %v483_v23, -inf }
 0x1a6   : > { %487 = vmax.xlane.f32.xlu0 %v486_v24 }
 0x1a8   : > { %v808_v27 = vpop.eup %807 }
 0x1a9   : > { %v356_v39 = vsel %vm349_vm2, %v808_v27, 0.0 }
 0x1b0   : > { %v364_v26 = vpop.permute.xlu0 %363 }
 0x1b1   : > { %384 = vmatpush.msra.mxu3 %v364_v26 }
 0x1b2   : > { %745 = vmatmul.msk.f32.vlgmr.msra.gmra.mxu3 %vm349_vm2, %v808_v27 }
 0x1b3   : > { %746 = vmatpush.xpose.msk.msrb.mxu3 %vm322_vm1, %v393_v14  ;;  %v612_v14 = vld [vmem:[%s1106_s4 + $0x10] sm:$0xff] }
 0x1b7   : > { %752 = vmatpush.xpose.msk.msra.mxu3 %vm322_vm1, %v529_v13  ;;  %v613_v13 = vld [vmem:[%s1106_s4 + $0x18] sm:$0xff] }
 0x1b8   : > { %v432_v28 = vpop.permute.xlu0 %431 }
 0x1b9   : > { %452 = vmatpush.msrb.mxu2 %v432_v28 }
 0x1ba   : > { %747 = vmatmul.msk.f32.vlgmr.msrb.gmra.mxu3 %vm322_vm1, %v391_v15  ;;  %v611_v15 = vld [vmem:[%s1106_s4 + $0x8] sm:$0xff] }
 0x1c2   : > { %753 = vmatmul.msk.f32.vlgmr.msra.gmra.mxu3 %vm322_vm1, %v527_v16  ;;  %v610_v16 = vld [vmem:[%s1106_s4] sm:$0xff] }
 0x219   : > { %v488_v29 = vpop.xlane.xlu0 %487 }
 0x21a   : > { %v489_v30 = vsub.f32 %v483_v23, %v488_v29  ;;  %v806_v29 = vld [vmem:[%s1107_s5] ss:$0 sm:$0xff] }
 0x21c   : > { %v490_v31 = vmul.f32 1.442695, %v489_v30 }
 0x21e   : > { %809 = vpow2.f32 %v490_v31 }
 0x224   : > { %v810_v32 = vpop.eup %809 }
 0x225   : > { %v492_v33 = vsel %vm349_vm2, %v810_v32, 0.0 }
 0x226   : > { %493 = vadd.xlane.f32.xlu0 %v492_v33 }
 0x235   : > { %v1024_v34 = vpop.f32.mrf.mxu3 }
 0x23d   : > { %v415_v35 = vpop.f32.mrf.mxu3 }
 0x23e   : > { %v418_v36 = vsel %vm349_vm2, %v415_v35, -inf }
 0x23f   : > { %419 = vmax.xlane.f32.xlu1 %v418_v36 }
 0x245   : > { %v551_v37 = vpop.f32.mrf.mxu3 }
 0x246   : > { %v554_v38 = vsel %vm349_vm2, %v551_v37, -inf }
 0x247   : > { %555 = vmax.xlane.f32.xlu2 %v554_v38 }
 0x258   : > { %499 = vrot.lane.b32.xlu1 %v319_v11, %s892_s29 }
 0x25f   : > { %567 = vrot.lane.b32.xlu2 %v319_v11, %s893_s9  ;;  %v615_v11 = vld [vmem:[%s1106_s4 + $0x28] sm:$0xff] }
 0x260   : > { %636 = vmatpush.msrb.mxu0 %v615_v11 }
 0x262   : > { %637 = vmatpush.msrb.mxu0 %v614_v12 }
 0x264   : > { %638 = vmatpush.msrb.mxu0 %v613_v13 }
 0x266   : > { %639 = vmatpush.msrb.mxu0 %v612_v14 }
 0x268   : > { %640 = vmatpush.msrb.mxu0 %v611_v15 }
 0x26a   : > { %641 = vmatpush.msrb.mxu0 %v610_v16 }
 0x282   : > { %357 = vadd.xlane.f32.xlu1 %v356_v39 }
 0x299   : > { %v494_v52 = vpop.xlane.xlu0 %493 }
 0x2b2   : > { %v420_v40 = vpop.xlane.xlu1 %419 }
 0x2b3   : > { %v421_v41 = vsub.f32 %v415_v35, %v420_v40 }
 0x2b5   : > { %v422_v42 = vmul.f32 1.442695, %v421_v41 }
 0x2b7   : > { %811 = vpow2.f32 %v422_v42 }
 0x2ba   : > { %v556_v43 = vpop.xlane.xlu2 %555 }
 0x2bb   : > { %v557_v44 = vsub.f32 %v551_v37, %v556_v43 }
 0x2bd   : > { %v812_v45 = vpop.eup %811  ;;  %v558_v46 = vmul.f32 1.442695, %v557_v44 }
 0x2be   : > { %748 = vmatmul.msk.f32.vlgmr.msrb.gmra.mxu2 %vm349_vm2, %v812_v45  ;;  %v424_v47 = vsel %vm349_vm2, %v812_v45, 0.0 }
 0x2bf   : > { %813 = vpow2.f32 %v558_v46  ;;  %425 = vadd.xlane.f32.xlu0 %v424_v47 }
 0x2c0   : > { %815 = vrcp.f32 %v494_v52 }
 0x2c2   : > { %v568_v48 = vpop.permute.xlu2 %567 }
 0x2c3   : > { %588 = vmatpush.msra.mxu2 %v568_v48 }
 0x2c5   : > { %v814_v49 = vpop.eup %813 }
 0x2c6   : > { %754 = vmatmul.msk.f32.vlgmr.msra.gmra.mxu2 %vm349_vm2, %v814_v49  ;;  %v560_v50 = vsel %vm349_vm2, %v814_v49, 0.0  ;;  %v816_v54 = vpop.eup %815 }
 0x2c7   : > { %561 = vadd.xlane.f32.xlu2 %v560_v50  ;;  %v496_v55 = vmul.f32 %v816_v54, %v494_v52 }
 0x2c9   : > { %v497_v56 = vsub.f32 2.0, %v496_v55 }
 0x2ca   : > { %v500_v51 = vpop.permute.xlu1 %499 }
 0x2cb   : > { %520 = vmatpush.msra.mxu1 %v500_v51  ;;  %v498_v60 = vmul.f32 %v816_v54, %v497_v56 }
 0x2cc   : > { %751 = vmatmul.msk.f32.vlgmr.msra.gmra.mxu1 %vm349_vm2, %v810_v32 }
 0x2f5   : > { %v358_v17 = vpop.xlane.xlu1 %357 }
 0x332   : > { %v426_v53 = vpop.xlane.xlu0 %425 }
 0x333   : > { %817 = vrcp.f32 %v426_v53 }
 0x339   : > { %v818_v58 = vpop.eup %817 }
 0x33a   : > { %v562_v57 = vpop.xlane.xlu2 %561  ;;  %v428_v59 = vmul.f32 %v818_v58, %v426_v53 }
 0x33b   : > { %819 = vrcp.f32 %v562_v57 }
 0x33c   : > { %v429_v63 = vsub.f32 2.0, %v428_v59  ;;  %821 = vrcp.f32 %v358_v17 }
 0x33e   : > { %v430_v3 = vmul.f32 %v818_v58, %v429_v63 }
 0x341   : > { %v820_v0 = vpop.eup %819  ;;  %v454_v1 = vpop.f32.mrf.mxu2 }
 0x342   : > { %v564_v2 = vmul.f32 %v820_v0, %v562_v57  ;;  %v457_v4 = vmul.f32 %v454_v1, %v430_v3  ;;  %v822_v18 = vpop.eup %821 }
 0x343   : > { %v360_v19 = vmul.f32 %v822_v18, %v358_v17 }
 0x344   : > { %v565_v5 = vsub.f32 2.0, %v564_v2 }
 0x345   : > { %v361_v21 = vsub.f32 2.0, %v360_v19 }
 0x346   : > { %v566_v7 = vmul.f32 %v820_v0, %v565_v5 }
 0x347   : > { %v362_v22 = vmul.f32 %v822_v18, %v361_v21 }
 0x349   : > { %v522_v61 = vpop.f32.mrf.mxu1  ;;  %v590_v6 = vpop.f32.mrf.mxu2  ;;  %v389_v24 = vmul.f32 %v1024_v34, %v362_v22 }
 0x34a   : > { %v525_v62 = vmul.f32 %v522_v61, %v498_v60  ;;  %v593_v8 = vmul.f32 %v590_v6, %v566_v7 }
 0x34c   : > { %599 = vrot.lane.b32.xlu0 %v525_v62, %s892_s29  ;;  %s839_s29 = scalar_lea.hbm %s838_s25, 8 }
 0x34d   : > { %p840_p11 = scmp.ne.s32.totalorder %s838_s25, %s839_s29  ;;  %p845_p1 = scmp.lt.s32.totalorder %s843_s12, %s839_s29 }
 0x34f   : > { %p841_p12 = pnand %p840_p11, %p967_p5  ;;  %p846_p2 = por %p845_p1, %p844_p0 }
 0x351   : > { %p842_p13 = pneg %p841_p12 }
 0x353   : > { %p847_p3 = pnand %p846_p2, %p842_p13 }
 0x354   : > { %595 = vrot.lane.b32.xlu0 %v457_v4, %s893_s9 }
 0x35c   : > { %603 = vrot.lane.b32.xlu0 %v593_v8, %s891_s28  ;;  %s648_s28 = scalar_lea.sflag [#allocation3], %s253_s11 }
 0x3be   : > { %v600_v20 = vpop.permute.xlu0 %599 }
 0x3c6   : > { %v596_v23 = vpop.permute.xlu0 %595 }
 0x3c7   : > { %v606_v25 = vsel %vm322_vm1, %v389_v24, %v596_v23 }
 0x3c8   : > { %v607_v26 = vsel %vm270_vm0, %v606_v25, %v600_v20 }
 0x3ce   : > { %v604_v27 = vpop.permute.xlu0 %603 }
 0x3cf   : > { %v609_v28 = vsel %vm608_vm3, %v607_v26, %v604_v27 }
 0x3d0   : > { %755 = vmatmul.msk.f32.vlgmr.msrb.gmra.mxu0 %vm622_vm4, %v609_v28 }
 0x44d   : > { %v643_v30 = vpop.f32.mrf.mxu0 }
 0x44e   : > { %v644_v31 = vadd.f32 %v806_v29, %v643_v30 }
 0x450   : > { %646 = vst.msk [vmem:[%s255_s20] sm:$0xff] %vm270_vm0, %v644_v31 }
 0x451   : > { %850 = shalt.err (!%p847_p3)
}
 0x452   : > { %760 = dma.vmem_to_hbm [thread:$0]  (%p967_p5), %s661_s18, 128, %s663_s26, %s648_s28  }
 0x453 PF: > { %p766_p4 = scmp.ge.s32.totalorder %s885_s24, 2  ;;  %s674_s11 = sand.u32 1, %s873_s21  }
 0x454   : > { %s675_s15 = scalar_lea.sflag [#allocation3], %s674_s11 }
 0x455   : > { %p763_p7 = pnand %p766_p4, %p971_p6 }
 0x457   : > { %p764_p8 = pneg %p763_p7 }
 0x459   : > { %868 = dma.done.wait (%p764_p8), %s675_s15, 128  }
 0x45a   : > { %870 = vsyncadd (%p764_p8), %s675_s15, 4294967168  ;;  %p16_p9 = scmp.ge.s32.totalorder %s954_s27, 4   ;;  %s1111_s21 = smov %s877_s22 }
 0x45b   : > { %s1112_s22 = smov %s881_s23  ;;  %s1113_s23 = smov %s965_s30 }
 0x45c   : > { %s1114_s24 = smov %s954_s27  ;;  %18 = sbr.rel (!%p16_p9) target bundleno = 3 (0x3), region = 82 }
 0x461   :  { %681 = vsyncpa [#allocation3], 1 }
 0x462   :  { %683 = vsyncpa [#allocation3 + $0x1], 1 }

</bundles_post_ra>
